<compile_context>
chip_gen: v7x
topology: tpu7x:2x2x1
jax: 0.10.0
libtpu: 0.0.40
codegen_flags: <defaults>
</compile_context>

<pallas_src>
import jax
import jax.numpy as jnp
from jax import lax
from jax.experimental import pallas as pl
from jax.experimental.pallas import tpu as pltpu


def srnn_kernel(initx_ref, a_ref, eps_ref,
                w1_ref, b1_ref, w2_ref, b2_ref,
                wih_ref, whh_ref, bcell_ref,
                we_ref, be_ref, wms_ref, bms_ref,
                out_ref,
                px_ref, h_ref):
    TB, _ = a_ref.shape
    B, O = initx_ref.shape
    H = whh_ref.shape[0]
    T = TB // B

    # ---- init_encoder: Linear -> ReLU -> Linear -> Tanh (batched, off serial path)
    z1 = jnp.maximum(
        jnp.dot(initx_ref[...], w1_ref[...],
                preferred_element_type=jnp.float32) + b1_ref[...], 0.0)
    h0 = jnp.tanh(
        jnp.dot(z1, w2_ref[...],
                preferred_element_type=jnp.float32) + b2_ref[...])

    # ---- batched input projection for all timesteps:
    #      px = A_flat @ W_ih + (b_ih + b_hh)   -> (T*B, H)
    px_ref[...] = (jnp.dot(a_ref[...], wih_ref[...],
                           preferred_element_type=jnp.float32) + bcell_ref[...])

    # ---- serial recurrence: only h_{t-1} @ W_hh stays on the critical path
    def step(t, h_prev):
        row = pl.multiple_of(t * B, B)
        pre = px_ref[pl.ds(row, B), :] + jnp.dot(
            h_prev, whh_ref[...], preferred_element_type=jnp.float32)
        h = jnp.tanh(pre)
        h_ref[pl.ds(row, B), :] = h
        return h

    lax.fori_loop(0, T, step, h0, unroll=True)

    # ---- emission heads, batched over all T*B rows (off the serial path)
    h_all = h_ref[...]                                             # (T*B, H)
    emission = jnp.maximum(
        jnp.dot(h_all, we_ref[...],
                preferred_element_type=jnp.float32) + be_ref[...], 0.0)
    ms = jnp.dot(emission, wms_ref[...],
                 preferred_element_type=jnp.float32) + bms_ref[...]  # (T*B, 2*O)
    mean = ms[:, :O]
    sigma = jnp.exp(ms[:, O:])
    pred = mean + sigma * eps_ref[...]

    # single packed output, written once
    out_ref[0] = pred
    out_ref[1] = mean
    out_ref[2] = sigma


def srnn_forward(init_x, a, eps, p):
    T, B, I = a.shape
    O = init_x.shape[1]
    H = p['whh'].shape[0]

    # flatten time into rows; fold / fuse parameters (cheap host-side prep)
    a_flat = a.reshape(T * B, I)
    eps_flat = eps.reshape(T * B, O)
    bcell = p['bih'] + p['bhh']                                   # (1, H)
    wms = jnp.concatenate([p['wm'], p['ws']], axis=1)             # (H, 2*O)
    bms = jnp.concatenate([p['bm'], p['bs']], axis=1)             # (1, 2*O)

    def full_spec(shape):
        nd = len(shape)
        return pl.BlockSpec(shape, lambda i, _nd=nd: (0,) * _nd)

    in_specs = [
        full_spec((B, O)),            # init_X
        full_spec((T * B, I)),        # A (flattened)
        full_spec((T * B, O)),        # eps (flattened)
        full_spec((O, H)), full_spec((1, H)),     # init_encoder linear 1
        full_spec((H, H)), full_spec((1, H)),     # init_encoder linear 2
        full_spec((I, H)),                        # RNN W_ih
        full_spec((H, H)),                        # RNN W_hh
        full_spec((1, H)),                        # folded b_ih + b_hh
        full_spec((H, H)), full_spec((1, H)),     # emission linear
        full_spec((H, 2 * O)), full_spec((1, 2 * O)),  # fused mean|sigma head
    ]
    out_specs = full_spec((3, T * B, O))
    out_shape = jax.ShapeDtypeStruct((3, T * B, O), jnp.float32)

    grid_spec = pltpu.PrefetchScalarGridSpec(
        num_scalar_prefetch=0,
        grid=(1,),
        in_specs=in_specs,
        out_specs=out_specs,
        scratch_shapes=[
            pltpu.VMEM((T * B, H), jnp.float32),   # px: batched input projection
            pltpu.VMEM((T * B, H), jnp.float32),   # h:  hidden states for all t
        ],
    )

    fn = pl.pallas_call(
        srnn_kernel,
        grid_spec=grid_spec,
        out_shape=out_shape,
        compiler_params=pltpu.CompilerParams(
            dimension_semantics=("arbitrary",)),   # single sequential step
    )
    out = fn(init_x, a_flat, eps_flat,
             p['w1'], p['b1'], p['w2'], p['b2'],
             p['wih'], p['whh'], bcell,
             p['we'], p['be'], wms, bms)

    pred = out[0].reshape(T, B, O)
    mean = out[1].reshape(T, B, O)
    sigma = out[2].reshape(T, B, O)
    return pred, mean, sigma


def srnn_reference(init_x, a, eps, p):
    """Plain-JAX reference of the same forward pass (for correctness check)."""
    h = jnp.tanh(jnp.maximum(init_x @ p['w1'] + p['b1'], 0.0) @ p['w2'] + p['b2'])
    preds, means, sigmas = [], [], []
    for t in range(a.shape[0]):
        h = jnp.tanh(a[t] @ p['wih'] + p['bih'] + h @ p['whh'] + p['bhh'])
        e = jnp.maximum(h @ p['we'] + p['be'], 0.0)
        m = e @ p['wm'] + p['bm']
        s = jnp.exp(e @ p['ws'] + p['bs'])
        means.append(m)
        sigmas.append(s)
        preds.append(m + s * eps[t])
    return jnp.stack(preds), jnp.stack(means), jnp.stack(sigmas)


def xavier_uniform(key, fan_in, fan_out):
    bound = (6.0 / (fan_in + fan_out)) ** 0.5
    return jax.random.uniform(key, (fan_in, fan_out), jnp.float32, -bound, bound)


if __name__ == "__main__":
    # Small shapes consistent with the module's forward:
    #   init_X : [batch, output_dim], A : [seq, batch, input_dim]
    SEQ, BATCH = 8, 8
    INPUT_DIM, HIDDEN_DIM, OUTPUT_DIM = 4, 32, 4

    key = jax.random.PRNGKey(0)
    keys = jax.random.split(key, 12)

    params = {
        # init_encoder: Linear(O,H) -> ReLU -> Linear(H,H) -> Tanh
        'w1': xavier_uniform(keys[0], OUTPUT_DIM, HIDDEN_DIM),
        'b1': jnp.full((1, HIDDEN_DIM), 0.01, jnp.float32),
        'w2': xavier_uniform(keys[1], HIDDEN_DIM, HIDDEN_DIM),
        'b2': jnp.full((1, HIDDEN_DIM), 0.01, jnp.float32),
        # nn.RNN(input_dim, hidden_dim)
        'wih': xavier_uniform(keys[2], INPUT_DIM, HIDDEN_DIM),
        'bih': jnp.full((1, HIDDEN_DIM), 0.01, jnp.float32),
        'whh': xavier_uniform(keys[3], HIDDEN_DIM, HIDDEN_DIM),
        'bhh': jnp.full((1, HIDDEN_DIM), 0.01, jnp.float32),
        # emission: Linear(H,H) -> ReLU
        'we': xavier_uniform(keys[4], HIDDEN_DIM, HIDDEN_DIM),
        'be': jnp.full((1, HIDDEN_DIM), 0.01, jnp.float32),
        # emission_mean: Linear(H,O)
        'wm': xavier_uniform(keys[5], HIDDEN_DIM, OUTPUT_DIM),
        'bm': jnp.full((1, OUTPUT_DIM), 0.01, jnp.float32),
        # emission_sigma: Linear(H,O)  (noise=None branch)
        'ws': xavier_uniform(keys[6], HIDDEN_DIM, OUTPUT_DIM),
        'bs': jnp.full((1, OUTPUT_DIM), 0.01, jnp.float32),
    }

    init_x = jax.random.normal(keys[7], (BATCH, OUTPUT_DIM), jnp.float32)
    a = jax.random.normal(keys[8], (SEQ, BATCH, INPUT_DIM), jnp.float32)
    # reparametrisation noise (eps ~ N(0,1)) precomputed for determinism
    eps = jax.random.normal(keys[9], (SEQ, BATCH, OUTPUT_DIM), jnp.float32)

    pred, mean, sigma = srnn_forward(init_x, a, eps, params)
    jax.block_until_ready((pred, mean, sigma))

    # sanity-check against plain-JAX reference
    pred_r, mean_r, sigma_r = srnn_reference(init_x, a, eps, params)
    assert jnp.allclose(pred, pred_r, atol=1e-4, rtol=1e-4)
    assert jnp.allclose(mean, mean_r, atol=1e-4, rtol=1e-4)
    assert jnp.allclose(sigma, sigma_r, atol=1e-4, rtol=1e-4)

    print("KERNEL_OK")
</pallas_src>

<mosaic_0001>
module attributes {stable_mosaic.version = 11 : i64} {
  func.func @srnn_kernel(%arg0: i32, %arg1: memref<8x4xf32, #tpu.memory_space<vmem>>, %arg2: memref<64x4xf32, #tpu.memory_space<vmem>>, %arg3: memref<64x4xf32, #tpu.memory_space<vmem>>, %arg4: memref<4x32xf32, #tpu.memory_space<vmem>>, %arg5: memref<1x32xf32, #tpu.memory_space<vmem>>, %arg6: memref<32x32xf32, #tpu.memory_space<vmem>>, %arg7: memref<1x32xf32, #tpu.memory_space<vmem>>, %arg8: memref<4x32xf32, #tpu.memory_space<vmem>>, %arg9: memref<32x32xf32, #tpu.memory_space<vmem>>, %arg10: memref<1x32xf32, #tpu.memory_space<vmem>>, %arg11: memref<32x32xf32, #tpu.memory_space<vmem>>, %arg12: memref<1x32xf32, #tpu.memory_space<vmem>>, %arg13: memref<32x8xf32, #tpu.memory_space<vmem>>, %arg14: memref<1x8xf32, #tpu.memory_space<vmem>>, %arg15: memref<3x64x4xf32, #tpu.memory_space<vmem>>, %arg16: memref<64x32xf32, #tpu.memory_space<vmem>>, %arg17: memref<64x32xf32, #tpu.memory_space<vmem>>) attributes {dimension_semantics = [#tpu.dimension_semantics<arbitrary>], iteration_bounds = array<i64: 1>, scalar_prefetch = 0 : i64, scratch_operands = 2 : i64, tpu.core_type = #tpu.core_type<tc>, window_params = [{pipeline_mode = #tpu.pipeline_mode<synchronous>, transform_indices = @transform_0, window_bounds = array<i64: 8, 4>}, {pipeline_mode = #tpu.pipeline_mode<synchronous>, transform_indices = @transform_1, window_bounds = array<i64: 64, 4>}, {pipeline_mode = #tpu.pipeline_mode<synchronous>, transform_indices = @transform_2, window_bounds = array<i64: 64, 4>}, {pipeline_mode = #tpu.pipeline_mode<synchronous>, transform_indices = @transform_3, window_bounds = array<i64: 4, 32>}, {pipeline_mode = #tpu.pipeline_mode<synchronous>, transform_indices = @transform_4, window_bounds = array<i64: 1, 32>}, {pipeline_mode = #tpu.pipeline_mode<synchronous>, transform_indices = @transform_5, window_bounds = array<i64: 32, 32>}, {pipeline_mode = #tpu.pipeline_mode<synchronous>, transform_indices = @transform_6, window_bounds = array<i64: 1, 32>}, {pipeline_mode = #tpu.pipeline_mode<synchronous>, transform_indices = @transform_7, window_bounds = array<i64: 4, 32>}, {pipeline_mode = #tpu.pipeline_mode<synchronous>, transform_indices = @transform_8, window_bounds = array<i64: 32, 32>}, {pipeline_mode = #tpu.pipeline_mode<synchronous>, transform_indices = @transform_9, window_bounds = array<i64: 1, 32>}, {pipeline_mode = #tpu.pipeline_mode<synchronous>, transform_indices = @transform_10, window_bounds = array<i64: 32, 32>}, {pipeline_mode = #tpu.pipeline_mode<synchronous>, transform_indices = @transform_11, window_bounds = array<i64: 1, 32>}, {pipeline_mode = #tpu.pipeline_mode<synchronous>, transform_indices = @transform_12, window_bounds = array<i64: 32, 8>}, {pipeline_mode = #tpu.pipeline_mode<synchronous>, transform_indices = @transform_13, window_bounds = array<i64: 1, 8>}, {pipeline_mode = #tpu.pipeline_mode<synchronous>, transform_indices = @transform_14, window_bounds = array<i64: 3, 64, 4>}]} {
    %c0 = arith.constant 0 : index
    %c0_0 = arith.constant 0 : index
    %0 = vector.load %arg1[%c0, %c0_0] : memref<8x4xf32, #tpu.memory_space<vmem>>, vector<8x4xf32>
    %c0_1 = arith.constant 0 : index
    %c0_2 = arith.constant 0 : index
    %1 = vector.load %arg4[%c0_1, %c0_2] : memref<4x32xf32, #tpu.memory_space<vmem>>, vector<4x32xf32>
    %cst = arith.constant dense<0.000000e+00> : vector<8x32xf32>
    %2 = tpu.matmul %0, %1, %cst {dimension_numbers = #tpu.dot_dimension_numbers<[1], [0], [0], [1], [0, 0, 1, 1], [], []>} : vector<8x4xf32>, vector<4x32xf32>, vector<8x32xf32> -> vector<8x32xf32>
    %c0_3 = arith.constant 0 : index
    %c0_4 = arith.constant 0 : index
    %3 = vector.load %arg5[%c0_3, %c0_4] : memref<1x32xf32, #tpu.memory_space<vmem>>, vector<1x32xf32>
    %4 = vector.broadcast %3 : vector<1x32xf32> to vector<8x32xf32>
    %5 = arith.addf %2, %4 : vector<8x32xf32>
    %cst_5 = arith.constant 0.000000e+00 : f32
    %6 = vector.broadcast %cst_5 : f32 to vector<8x32xf32>
    %7 = arith.maximumf %5, %6 : vector<8x32xf32>
    %c0_6 = arith.constant 0 : index
    %c0_7 = arith.constant 0 : index
    %8 = vector.load %arg6[%c0_6, %c0_7] : memref<32x32xf32, #tpu.memory_space<vmem>>, vector<32x32xf32>
    %cst_8 = arith.constant dense<0.000000e+00> : vector<8x32xf32>
    %9 = tpu.matmul %7, %8, %cst_8 {dimension_numbers = #tpu.dot_dimension_numbers<[1], [0], [0], [1], [0, 0, 1, 1], [], []>} : vector<8x32xf32>, vector<32x32xf32>, vector<8x32xf32> -> vector<8x32xf32>
    %c0_9 = arith.constant 0 : index
    %c0_10 = arith.constant 0 : index
    %10 = vector.load %arg7[%c0_9, %c0_10] : memref<1x32xf32, #tpu.memory_space<vmem>>, vector<1x32xf32>
    %11 = vector.broadcast %10 : vector<1x32xf32> to vector<8x32xf32>
    %12 = arith.addf %9, %11 : vector<8x32xf32>
    %13 = math.tanh %12 : vector<8x32xf32>
    %c0_11 = arith.constant 0 : index
    %c0_12 = arith.constant 0 : index
    %14 = vector.load %arg2[%c0_11, %c0_12] : memref<64x4xf32, #tpu.memory_space<vmem>>, vector<64x4xf32>
    %c0_13 = arith.constant 0 : index
    %c0_14 = arith.constant 0 : index
    %15 = vector.load %arg8[%c0_13, %c0_14] : memref<4x32xf32, #tpu.memory_space<vmem>>, vector<4x32xf32>
    %cst_15 = arith.constant dense<0.000000e+00> : vector<64x32xf32>
    %16 = tpu.matmul %14, %15, %cst_15 {dimension_numbers = #tpu.dot_dimension_numbers<[1], [0], [0], [1], [0, 0, 1, 1], [], []>} : vector<64x4xf32>, vector<4x32xf32>, vector<64x32xf32> -> vector<64x32xf32>
    %c0_16 = arith.constant 0 : index
    %c0_17 = arith.constant 0 : index
    %17 = vector.load %arg10[%c0_16, %c0_17] : memref<1x32xf32, #tpu.memory_space<vmem>>, vector<1x32xf32>
    %18 = vector.broadcast %17 : vector<1x32xf32> to vector<64x32xf32>
    %19 = arith.addf %16, %18 : vector<64x32xf32>
    %c0_18 = arith.constant 0 : index
    %c0_19 = arith.constant 0 : index
    %20 = vector.load %arg16[%c0_18, %c0_19] : memref<64x32xf32, #tpu.memory_space<vmem>>, vector<64x32xf32>
    tpu.vector_store %arg16[%c0_18, %c0_19], %19 {strides = array<i32>} : memref<64x32xf32, #tpu.memory_space<vmem>>, vector<64x32xf32>,
    %c0_i32 = arith.constant 0 : i32
    %c8_i32 = arith.constant 8 : i32
    %21 = arith.muli %c0_i32, %c8_i32 : i32
    %22 = tpu.assume_multiple %21, 8 : i32
    %23 = arith.index_cast %22 : i32 to index
    %c0_20 = arith.constant 0 : index
    %24 = vector.load %arg16[%23, %c0_20] : memref<64x32xf32, #tpu.memory_space<vmem>>, vector<8x32xf32>
    %c0_21 = arith.constant 0 : index
    %c0_22 = arith.constant 0 : index
    %25 = vector.load %arg9[%c0_21, %c0_22] : memref<32x32xf32, #tpu.memory_space<vmem>>, vector<32x32xf32>
    %cst_23 = arith.constant dense<0.000000e+00> : vector<8x32xf32>
    %26 = tpu.matmul %13, %25, %cst_23 {dimension_numbers = #tpu.dot_dimension_numbers<[1], [0], [0], [1], [0, 0, 1, 1], [], []>} : vector<8x32xf32>, vector<32x32xf32>, vector<8x32xf32> -> vector<8x32xf32>
    %27 = arith.addf %24, %26 : vector<8x32xf32>
    %28 = math.tanh %27 : vector<8x32xf32>
    %29 = arith.index_cast %22 : i32 to index
    %c0_24 = arith.constant 0 : index
    %30 = vector.load %arg17[%29, %c0_24] : memref<64x32xf32, #tpu.memory_space<vmem>>, vector<8x32xf32>
    tpu.vector_store %arg17[%29, %c0_24], %28 {strides = array<i32>} : memref<64x32xf32, #tpu.memory_space<vmem>>, vector<8x32xf32>,
    %c1_i32 = arith.constant 1 : i32
    %c8_i32_25 = arith.constant 8 : i32
    %31 = arith.muli %c1_i32, %c8_i32_25 : i32
    %32 = tpu.assume_multiple %31, 8 : i32
    %33 = arith.index_cast %32 : i32 to index
    %c0_26 = arith.constant 0 : index
    %34 = vector.load %arg16[%33, %c0_26] : memref<64x32xf32, #tpu.memory_space<vmem>>, vector<8x32xf32>
    %c0_27 = arith.constant 0 : index
    %c0_28 = arith.constant 0 : index
    %35 = vector.load %arg9[%c0_27, %c0_28] : memref<32x32xf32, #tpu.memory_space<vmem>>, vector<32x32xf32>
    %cst_29 = arith.constant dense<0.000000e+00> : vector<8x32xf32>
    %36 = tpu.matmul %28, %35, %cst_29 {dimension_numbers = #tpu.dot_dimension_numbers<[1], [0], [0], [1], [0, 0, 1, 1], [], []>} : vector<8x32xf32>, vector<32x32xf32>, vector<8x32xf32> -> vector<8x32xf32>
    %37 = arith.addf %34, %36 : vector<8x32xf32>
    %38 = math.tanh %37 : vector<8x32xf32>
    %39 = arith.index_cast %32 : i32 to index
    %c0_30 = arith.constant 0 : index
    %40 = vector.load %arg17[%39, %c0_30] : memref<64x32xf32, #tpu.memory_space<vmem>>, vector<8x32xf32>
    tpu.vector_store %arg17[%39, %c0_30], %38 {strides = array<i32>} : memref<64x32xf32, #tpu.memory_space<vmem>>, vector<8x32xf32>,
    %c2_i32 = arith.constant 2 : i32
    %c8_i32_31 = arith.constant 8 : i32
    %41 = arith.muli %c2_i32, %c8_i32_31 : i32
    %42 = tpu.assume_multiple %41, 8 : i32
    %43 = arith.index_cast %42 : i32 to index
    %c0_32 = arith.constant 0 : index
    %44 = vector.load %arg16[%43, %c0_32] : memref<64x32xf32, #tpu.memory_space<vmem>>, vector<8x32xf32>
    %c0_33 = arith.constant 0 : index
    %c0_34 = arith.constant 0 : index
    %45 = vector.load %arg9[%c0_33, %c0_34] : memref<32x32xf32, #tpu.memory_space<vmem>>, vector<32x32xf32>
    %cst_35 = arith.constant dense<0.000000e+00> : vector<8x32xf32>
    %46 = tpu.matmul %38, %45, %cst_35 {dimension_numbers = #tpu.dot_dimension_numbers<[1], [0], [0], [1], [0, 0, 1, 1], [], []>} : vector<8x32xf32>, vector<32x32xf32>, vector<8x32xf32> -> vector<8x32xf32>
    %47 = arith.addf %44, %46 : vector<8x32xf32>
    %48 = math.tanh %47 : vector<8x32xf32>
    %49 = arith.index_cast %42 : i32 to index
    %c0_36 = arith.constant 0 : index
    %50 = vector.load %arg17[%49, %c0_36] : memref<64x32xf32, #tpu.memory_space<vmem>>, vector<8x32xf32>
    tpu.vector_store %arg17[%49, %c0_36], %48 {strides = array<i32>} : memref<64x32xf32, #tpu.memory_space<vmem>>, vector<8x32xf32>,
    %c3_i32 = arith.constant 3 : i32
    %c8_i32_37 = arith.constant 8 : i32
    %51 = arith.muli %c3_i32, %c8_i32_37 : i32
    %52 = tpu.assume_multiple %51, 8 : i32
    %53 = arith.index_cast %52 : i32 to index
    %c0_38 = arith.constant 0 : index
    %54 = vector.load %arg16[%53, %c0_38] : memref<64x32xf32, #tpu.memory_space<vmem>>, vector<8x32xf32>
    %c0_39 = arith.constant 0 : index
    %c0_40 = arith.constant 0 : index
    %55 = vector.load %arg9[%c0_39, %c0_40] : memref<32x32xf32, #tpu.memory_space<vmem>>, vector<32x32xf32>
    %cst_41 = arith.constant dense<0.000000e+00> : vector<8x32xf32>
    %56 = tpu.matmul %48, %55, %cst_41 {dimension_numbers = #tpu.dot_dimension_numbers<[1], [0], [0], [1], [0, 0, 1, 1], [], []>} : vector<8x32xf32>, vector<32x32xf32>, vector<8x32xf32> -> vector<8x32xf32>
    %57 = arith.addf %54, %56 : vector<8x32xf32>
    %58 = math.tanh %57 : vector<8x32xf32>
    %59 = arith.index_cast %52 : i32 to index
    %c0_42 = arith.constant 0 : index
    %60 = vector.load %arg17[%59, %c0_42] : memref<64x32xf32, #tpu.memory_space<vmem>>, vector<8x32xf32>
    tpu.vector_store %arg17[%59, %c0_42], %58 {strides = array<i32>} : memref<64x32xf32, #tpu.memory_space<vmem>>, vector<8x32xf32>,
    %c4_i32 = arith.constant 4 : i32
    %c8_i32_43 = arith.constant 8 : i32
    %61 = arith.muli %c4_i32, %c8_i32_43 : i32
    %62 = tpu.assume_multiple %61, 8 : i32
    %63 = arith.index_cast %62 : i32 to index
    %c0_44 = arith.constant 0 : index
    %64 = vector.load %arg16[%63, %c0_44] : memref<64x32xf32, #tpu.memory_space<vmem>>, vector<8x32xf32>
    %c0_45 = arith.constant 0 : index
    %c0_46 = arith.constant 0 : index
    %65 = vector.load %arg9[%c0_45, %c0_46] : memref<32x32xf32, #tpu.memory_space<vmem>>, vector<32x32xf32>
    %cst_47 = arith.constant dense<0.000000e+00> : vector<8x32xf32>
    %66 = tpu.matmul %58, %65, %cst_47 {dimension_numbers = #tpu.dot_dimension_numbers<[1], [0], [0], [1], [0, 0, 1, 1], [], []>} : vector<8x32xf32>, vector<32x32xf32>, vector<8x32xf32> -> vector<8x32xf32>
    %67 = arith.addf %64, %66 : vector<8x32xf32>
    %68 = math.tanh %67 : vector<8x32xf32>
    %69 = arith.index_cast %62 : i32 to index
    %c0_48 = arith.constant 0 : index
    %70 = vector.load %arg17[%69, %c0_48] : memref<64x32xf32, #tpu.memory_space<vmem>>, vector<8x32xf32>
    tpu.vector_store %arg17[%69, %c0_48], %68 {strides = array<i32>} : memref<64x32xf32, #tpu.memory_space<vmem>>, vector<8x32xf32>,
    %c5_i32 = arith.constant 5 : i32
    %c8_i32_49 = arith.constant 8 : i32
    %71 = arith.muli %c5_i32, %c8_i32_49 : i32
    %72 = tpu.assume_multiple %71, 8 : i32
    %73 = arith.index_cast %72 : i32 to index
    %c0_50 = arith.constant 0 : index
    %74 = vector.load %arg16[%73, %c0_50] : memref<64x32xf32, #tpu.memory_space<vmem>>, vector<8x32xf32>
    %c0_51 = arith.constant 0 : index
    %c0_52 = arith.constant 0 : index
    %75 = vector.load %arg9[%c0_51, %c0_52] : memref<32x32xf32, #tpu.memory_space<vmem>>, vector<32x32xf32>
    %cst_53 = arith.constant dense<0.000000e+00> : vector<8x32xf32>
    %76 = tpu.matmul %68, %75, %cst_53 {dimension_numbers = #tpu.dot_dimension_numbers<[1], [0], [0], [1], [0, 0, 1, 1], [], []>} : vector<8x32xf32>, vector<32x32xf32>, vector<8x32xf32> -> vector<8x32xf32>
    %77 = arith.addf %74, %76 : vector<8x32xf32>
    %78 = math.tanh %77 : vector<8x32xf32>
    %79 = arith.index_cast %72 : i32 to index
    %c0_54 = arith.constant 0 : index
    %80 = vector.load %arg17[%79, %c0_54] : memref<64x32xf32, #tpu.memory_space<vmem>>, vector<8x32xf32>
    tpu.vector_store %arg17[%79, %c0_54], %78 {strides = array<i32>} : memref<64x32xf32, #tpu.memory_space<vmem>>, vector<8x32xf32>,
    %c6_i32 = arith.constant 6 : i32
    %c8_i32_55 = arith.constant 8 : i32
    %81 = arith.muli %c6_i32, %c8_i32_55 : i32
    %82 = tpu.assume_multiple %81, 8 : i32
    %83 = arith.index_cast %82 : i32 to index
    %c0_56 = arith.constant 0 : index
    %84 = vector.load %arg16[%83, %c0_56] : memref<64x32xf32, #tpu.memory_space<vmem>>, vector<8x32xf32>
    %c0_57 = arith.constant 0 : index
    %c0_58 = arith.constant 0 : index
    %85 = vector.load %arg9[%c0_57, %c0_58] : memref<32x32xf32, #tpu.memory_space<vmem>>, vector<32x32xf32>
    %cst_59 = arith.constant dense<0.000000e+00> : vector<8x32xf32>
    %86 = tpu.matmul %78, %85, %cst_59 {dimension_numbers = #tpu.dot_dimension_numbers<[1], [0], [0], [1], [0, 0, 1, 1], [], []>} : vector<8x32xf32>, vector<32x32xf32>, vector<8x32xf32> -> vector<8x32xf32>
    %87 = arith.addf %84, %86 : vector<8x32xf32>
    %88 = math.tanh %87 : vector<8x32xf32>
    %89 = arith.index_cast %82 : i32 to index
    %c0_60 = arith.constant 0 : index
    %90 = vector.load %arg17[%89, %c0_60] : memref<64x32xf32, #tpu.memory_space<vmem>>, vector<8x32xf32>
    tpu.vector_store %arg17[%89, %c0_60], %88 {strides = array<i32>} : memref<64x32xf32, #tpu.memory_space<vmem>>, vector<8x32xf32>,
    %c7_i32 = arith.constant 7 : i32
    %c8_i32_61 = arith.constant 8 : i32
    %91 = arith.muli %c7_i32, %c8_i32_61 : i32
    %92 = tpu.assume_multiple %91, 8 : i32
    %93 = arith.index_cast %92 : i32 to index
    %c0_62 = arith.constant 0 : index
    %94 = vector.load %arg16[%93, %c0_62] : memref<64x32xf32, #tpu.memory_space<vmem>>, vector<8x32xf32>
    %c0_63 = arith.constant 0 : index
    %c0_64 = arith.constant 0 : index
    %95 = vector.load %arg9[%c0_63, %c0_64] : memref<32x32xf32, #tpu.memory_space<vmem>>, vector<32x32xf32>
    %cst_65 = arith.constant dense<0.000000e+00> : vector<8x32xf32>
    %96 = tpu.matmul %88, %95, %cst_65 {dimension_numbers = #tpu.dot_dimension_numbers<[1], [0], [0], [1], [0, 0, 1, 1], [], []>} : vector<8x32xf32>, vector<32x32xf32>, vector<8x32xf32> -> vector<8x32xf32>
    %97 = arith.addf %94, %96 : vector<8x32xf32>
    %98 = math.tanh %97 : vector<8x32xf32>
    %99 = arith.index_cast %92 : i32 to index
    %c0_66 = arith.constant 0 : index
    %100 = vector.load %arg17[%99, %c0_66] : memref<64x32xf32, #tpu.memory_space<vmem>>, vector<8x32xf32>
    tpu.vector_store %arg17[%99, %c0_66], %98 {strides = array<i32>} : memref<64x32xf32, #tpu.memory_space<vmem>>, vector<8x32xf32>,
    %c8_i32_67 = arith.constant 8 : i32
    %c0_68 = arith.constant 0 : index
    %c0_69 = arith.constant 0 : index
    %101 = vector.load %arg17[%c0_68, %c0_69] : memref<64x32xf32, #tpu.memory_space<vmem>>, vector<64x32xf32>
    %c0_70 = arith.constant 0 : index
    %c0_71 = arith.constant 0 : index
    %102 = vector.load %arg11[%c0_70, %c0_71] : memref<32x32xf32, #tpu.memory_space<vmem>>, vector<32x32xf32>
    %cst_72 = arith.constant dense<0.000000e+00> : vector<64x32xf32>
    %103 = tpu.matmul %101, %102, %cst_72 {dimension_numbers = #tpu.dot_dimension_numbers<[1], [0], [0], [1], [0, 0, 1, 1], [], []>} : vector<64x32xf32>, vector<32x32xf32>, vector<64x32xf32> -> vector<64x32xf32>
    %c0_73 = arith.constant 0 : index
    %c0_74 = arith.constant 0 : index
    %104 = vector.load %arg12[%c0_73, %c0_74] : memref<1x32xf32, #tpu.memory_space<vmem>>, vector<1x32xf32>
    %105 = vector.broadcast %104 : vector<1x32xf32> to vector<64x32xf32>
    %106 = arith.addf %103, %105 : vector<64x32xf32>
    %cst_75 = arith.constant 0.000000e+00 : f32
    %107 = vector.broadcast %cst_75 : f32 to vector<64x32xf32>
    %108 = arith.maximumf %106, %107 : vector<64x32xf32>
    %c0_76 = arith.constant 0 : index
    %c0_77 = arith.constant 0 : index
    %109 = vector.load %arg13[%c0_76, %c0_77] : memref<32x8xf32, #tpu.memory_space<vmem>>, vector<32x8xf32>
    %cst_78 = arith.constant dense<0.000000e+00> : vector<64x8xf32>
    %110 = tpu.matmul %108, %109, %cst_78 {dimension_numbers = #tpu.dot_dimension_numbers<[1], [0], [0], [1], [0, 0, 1, 1], [], []>} : vector<64x32xf32>, vector<32x8xf32>, vector<64x8xf32> -> vector<64x8xf32>
    %c0_79 = arith.constant 0 : index
    %c0_80 = arith.constant 0 : index
    %111 = vector.load %arg14[%c0_79, %c0_80] : memref<1x8xf32, #tpu.memory_space<vmem>>, vector<1x8xf32>
    %112 = vector.broadcast %111 : vector<1x8xf32> to vector<64x8xf32>
    %113 = arith.addf %110, %112 : vector<64x8xf32>
    %114 = vector.extract_strided_slice %113 {offsets = [0, 0], sizes = [64, 4], strides = [1, 1]} : vector<64x8xf32> to vector<64x4xf32>
    %115 = vector.extract_strided_slice %113 {offsets = [0, 4], sizes = [64, 4], strides = [1, 1]} : vector<64x8xf32> to vector<64x4xf32>
    %116 = math.exp %115 : vector<64x4xf32>
    %c0_81 = arith.constant 0 : index
    %c0_82 = arith.constant 0 : index
    %117 = vector.load %arg3[%c0_81, %c0_82] : memref<64x4xf32, #tpu.memory_space<vmem>>, vector<64x4xf32>
    %118 = arith.mulf %116, %117 : vector<64x4xf32>
    %119 = arith.addf %114, %118 : vector<64x4xf32>
    %c0_83 = arith.constant 0 : index
    %c0_84 = arith.constant 0 : index
    %c0_85 = arith.constant 0 : index
    %120 = vector.load %arg15[%c0_83, %c0_84, %c0_85] : memref<3x64x4xf32, #tpu.memory_space<vmem>>, vector<1x64x4xf32>
    %121 = vector.shape_cast %120 : vector<1x64x4xf32> to vector<64x4xf32>
    %122 = vector.shape_cast %119 : vector<64x4xf32> to vector<1x64x4xf32>
    tpu.vector_store %arg15[%c0_83, %c0_84, %c0_85], %122 {strides = array<i32>} : memref<3x64x4xf32, #tpu.memory_space<vmem>>, vector<1x64x4xf32>,
    %c1 = arith.constant 1 : index
    %c0_86 = arith.constant 0 : index
    %c0_87 = arith.constant 0 : index
    %123 = vector.load %arg15[%c1, %c0_86, %c0_87] : memref<3x64x4xf32, #tpu.memory_space<vmem>>, vector<1x64x4xf32>
    %124 = vector.shape_cast %123 : vector<1x64x4xf32> to vector<64x4xf32>
    %125 = vector.shape_cast %114 : vector<64x4xf32> to vector<1x64x4xf32>
    tpu.vector_store %arg15[%c1, %c0_86, %c0_87], %125 {strides = array<i32>} : memref<3x64x4xf32, #tpu.memory_space<vmem>>, vector<1x64x4xf32>,
    %c2 = arith.constant 2 : index
    %c0_88 = arith.constant 0 : index
    %c0_89 = arith.constant 0 : index
    %126 = vector.load %arg15[%c2, %c0_88, %c0_89] : memref<3x64x4xf32, #tpu.memory_space<vmem>>, vector<1x64x4xf32>
    %127 = vector.shape_cast %126 : vector<1x64x4xf32> to vector<64x4xf32>
    %128 = vector.shape_cast %116 : vector<64x4xf32> to vector<1x64x4xf32>
    tpu.vector_store %arg15[%c2, %c0_88, %c0_89], %128 {strides = array<i32>} : memref<3x64x4xf32, #tpu.memory_space<vmem>>, vector<1x64x4xf32>,
    return
  }
  func.func @transform_0(%arg0: i32) -> (i32, i32) {
    %c0_i32 = arith.constant 0 : i32
    %c0_i32_0 = arith.constant 0 : i32
    %c0_i32_1 = arith.constant 0 : i32
    return %c0_i32, %c0_i32_0 : i32, i32
  }
  func.func @transform_1(%arg0: i32) -> (i32, i32) {
    %c0_i32 = arith.constant 0 : i32
    %c0_i32_0 = arith.constant 0 : i32
    %c0_i32_1 = arith.constant 0 : i32
    return %c0_i32, %c0_i32_0 : i32, i32
  }
  func.func @transform_2(%arg0: i32) -> (i32, i32) {
    %c0_i32 = arith.constant 0 : i32
    %c0_i32_0 = arith.constant 0 : i32
    %c0_i32_1 = arith.constant 0 : i32
    return %c0_i32, %c0_i32_0 : i32, i32
  }
  func.func @transform_3(%arg0: i32) -> (i32, i32) {
    %c0_i32 = arith.constant 0 : i32
    %c0_i32_0 = arith.constant 0 : i32
    %c0_i32_1 = arith.constant 0 : i32
    return %c0_i32, %c0_i32_0 : i32, i32
  }
  func.func @transform_4(%arg0: i32) -> (i32, i32) {
    %c0_i32 = arith.constant 0 : i32
    %c0_i32_0 = arith.constant 0 : i32
    %c0_i32_1 = arith.constant 0 : i32
    return %c0_i32, %c0_i32_0 : i32, i32
  }
  func.func @transform_5(%arg0: i32) -> (i32, i32) {
    %c0_i32 = arith.constant 0 : i32
    %c0_i32_0 = arith.constant 0 : i32
    %c0_i32_1 = arith.constant 0 : i32
    return %c0_i32, %c0_i32_0 : i32, i32
  }
  func.func @transform_6(%arg0: i32) -> (i32, i32) {
    %c0_i32 = arith.constant 0 : i32
    %c0_i32_0 = arith.constant 0 : i32
    %c0_i32_1 = arith.constant 0 : i32
    return %c0_i32, %c0_i32_0 : i32, i32
  }
  func.func @transform_7(%arg0: i32) -> (i32, i32) {
    %c0_i32 = arith.constant 0 : i32
    %c0_i32_0 = arith.constant 0 : i32
    %c0_i32_1 = arith.constant 0 : i32
    return %c0_i32, %c0_i32_0 : i32, i32
  }
  func.func @transform_8(%arg0: i32) -> (i32, i32) {
    %c0_i32 = arith.constant 0 : i32
    %c0_i32_0 = arith.constant 0 : i32
    %c0_i32_1 = arith.constant 0 : i32
    return %c0_i32, %c0_i32_0 : i32, i32
  }
  func.func @transform_9(%arg0: i32) -> (i32, i32) {
    %c0_i32 = arith.constant 0 : i32
    %c0_i32_0 = arith.constant 0 : i32
    %c0_i32_1 = arith.constant 0 : i32
    return %c0_i32, %c0_i32_0 : i32, i32
  }
  func.func @transform_10(%arg0: i32) -> (i32, i32) {
    %c0_i32 = arith.constant 0 : i32
    %c0_i32_0 = arith.constant 0 : i32
    %c0_i32_1 = arith.constant 0 : i32
    return %c0_i32, %c0_i32_0 : i32, i32
  }
  func.func @transform_11(%arg0: i32) -> (i32, i32) {
    %c0_i32 = arith.constant 0 : i32
    %c0_i32_0 = arith.constant 0 : i32
    %c0_i32_1 = arith.constant 0 : i32
    return %c0_i32, %c0_i32_0 : i32, i32
  }
  func.func @transform_12(%arg0: i32) -> (i32, i32) {
    %c0_i32 = arith.constant 0 : i32
    %c0_i32_0 = arith.constant 0 : i32
    %c0_i32_1 = arith.constant 0 : i32
    return %c0_i32, %c0_i32_0 : i32, i32
  }
  func.func @transform_13(%arg0: i32) -> (i32, i32) {
    %c0_i32 = arith.constant 0 : i32
    %c0_i32_0 = arith.constant 0 : i32
    %c0_i32_1 = arith.constant 0 : i32
    return %c0_i32, %c0_i32_0 : i32, i32
  }
  func.func @transform_14(%arg0: i32) -> (i32, i32, i32) {
    %c0_i32 = arith.constant 0 : i32
    %c0_i32_0 = arith.constant 0 : i32
    %c0_i32_1 = arith.constant 0 : i32
    %c0_i32_2 = arith.constant 0 : i32
    return %c0_i32, %c0_i32_0, %c0_i32_1 : i32, i32, i32
  }
}

</mosaic_0001>

<bundles_post_ra>
// kernel: tpu_custom_call.1
= control target key start
LH: loop header
LB: loop body
LE: loop exit
PB: predicated region body
PF: predicated region fallthrough
CT: control target
= control target key end

     0   :  { %vm60_vm0 = vcmask 1043456   ;;  %vm56_vm1 = vcmask 31744   ;;  %v1905_v0 = vmov 0.0   ;;  %vm1906_vm2 = vmmov 0   ;;  %s1908_s22 = smov 4   ;;  %s1909_s25 = smov 124   ;;  %s2387_s3 = inlined_call_operand.vmem [shape: f32[4,32], index: 3, kind: input, shape index: {}]   ;;  %s2388_s0 = inlined_call_operand.vmem [shape: f32[8,4], index: 0, kind: input, shape index: {}]   ;;  %s2389_s5 = inlined_call_operand.vmem [shape: f32[32,32], index: 5, kind: input, shape index: {}]   ;;  %s2390_s4 = inlined_call_operand.vmem [shape: f32[1,32], index: 4, kind: input, shape index: {}]   ;;  %s2391_s7 = inlined_call_operand.vmem [shape: f32[4,32], index: 7, kind: input, shape index: {}]   ;;  %s2392_s1 = inlined_call_operand.vmem [shape: f32[64,4], index: 1, kind: input, shape index: {}]   ;;  %s2393_s8 = inlined_call_operand.vmem [shape: f32[32,32], index: 8, kind: input, shape index: {}]   ;;  %s2394_s6 = inlined_call_operand.vmem [shape: f32[1,32], index: 6, kind: input, shape index: {}]   ;;  %s2395_s9 = inlined_call_operand.vmem [shape: f32[1,32], index: 9, kind: input, shape index: {}]   ;;  %s2396_s10 = inlined_call_operand.vmem [shape: f32[32,32], index: 10, kind: input, shape index: {}]   ;;  %s2397_s12 = inlined_call_operand.vmem [shape: f32[32,8], index: 12, kind: input, shape index: {}]   ;;  %s2398_s2 = inlined_call_operand.vmem [shape: f32[64,4], index: 2, kind: input, shape index: {}]   ;;  %s2399_s11 = inlined_call_operand.vmem [shape: f32[1,32], index: 11, kind: input, shape index: {}]   ;;  %s2400_s13 = inlined_call_operand.vmem [shape: f32[1,8], index: 13, kind: input, shape index: {}]   ;;  %s2401_s14 = inlined_call_operand.vmem [shape: f32[3,64,4], index: 14, kind: output, shape index: {}]  }
   0x1   :  { %1638 = vmatprep.subr.mxu1 %v1905_v0  ;;  %v48_v1 = vld [vmem:[%s2387_s3] sm:$0xf]  ;;  %1640 = vmatprep.mubr.msk.f32.mxu1 %vm1906_vm2, %v1905_v0  ;;  %v136_v4 = vld [vmem:[%s2389_s5 + $0x8] sm:$0xff]  ;;  %v1907_v5 = vmov 0.0|0.0   ;;  %v137_v7 = vld [vmem:[%s2389_s5 + $0x10] sm:$0xff]  ;;  %vm146_vm3 = vcmask 261120  }
   0x2   :  { %v47_v2 = vld [vmem:[%s2388_s0] sm:$0xff]  ;;  %1639 = vmatpush3.msk.msra.mxu1 %vm60_vm0, %v48_v1  ;;  %v138_v8 = vld [vmem:[%s2389_s5 + $0x18] sm:$0xff]  ;;  %v222_v17 = vld [vmem:[%s2392_s1 + $0x8] sm:$0xff] }
   0x3   :  { %v135_v3 = vld [vmem:[%s2389_s5] sm:$0xff]  ;;  %1641 = vmatmul.mubr.msk.f32.vlgmr.msra.gmra.mrb[0].mxu1 %vm56_vm1, %v47_v2  ;;  %1796 = vmatprep.subr.bf16.mxu1 %v1907_v5  ;;  %v1800_v9 = vpack.c.bf16 %v138_v8, %v137_v7  ;;  %v379_v19 = vld [vmem:[%s2393_s8 + $0x8] sm:$0xff]  ;;  %v380_v20 = vld [vmem:[%s2393_s8 + $0x10] sm:$0xff] }
   0x4   :  { %v1797_v6 = vpack.c.bf16 %v136_v4, %v135_v3  ;;  %1651 = vmatprep.mubr.msk.f32.mxu1 %vm1906_vm2, %v1905_v0  ;;  %v1501_v10 = vld [vmem:[%s2390_s4] ss:$0 sm:$0xff]  ;;  %v381_v22 = vld [vmem:[%s2393_s8 + $0x18] sm:$0xff]  ;;  %v223_v24 = vld [vmem:[%s2392_s1 + $0x10] sm:$0xff] }
   0x5   :  { %v229_v15 = vld [vmem:[%s2391_s7] sm:$0xf]  ;;  %v2048_v23 = vpack.c.bf16 %v381_v22, %v380_v20  ;;  %v224_v35 = vld [vmem:[%s2392_s1 + $0x18] sm:$0xff]  ;;  %v226_v37 = vld [vmem:[%s2392_s1 + $0x28] sm:$0xff] }
   0x6   :  { %1798 = vmatpush3.bf16.msra.mxu1 %v1797_v6  ;;  %1654 = vmatprep.subr.msk.mxu0 %vm60_vm0, %v229_v15  ;;  %v221_v16 = vld [vmem:[%s2392_s1] sm:$0xff]  ;;  %v227_v38 = vld [vmem:[%s2392_s1 + $0x30] sm:$0xff]  ;;  %v228_v39 = vld [vmem:[%s2392_s1 + $0x38] sm:$0xff] }
   0x7   :  { %1799 = vmatprep.subr.bf16.mxu1 %v1907_v5  ;;  %1655 = vmatpush3.msk.msra.mxu0 %vm60_vm0, %v229_v15  ;;  %v378_v18 = vld [vmem:[%s2393_s8] sm:$0xff] }
   0x8   :  { %1656 = vmatprep.mubr.msk.f32.mxu0 %vm56_vm1, %v221_v16  ;;  %1808 = vmatprep.subr.bf16.mxu0 %v1907_v5  ;;  %v2042_v21 = vpack.c.bf16 %v379_v19, %v378_v18  ;;  %v1504_v25 = vld [vmem:[%s2394_s6] ss:$0 sm:$0xff]  ;;  %v1048_v16 = vld [vmem:[%s2396_s10 + $0x8] sm:$0xff] }
   0x9   :  { %1657 = vmatmul.mubr.msk.f32.vlgmr.msra.gmra.mrb[0].mxu0 %vm56_vm1, %v222_v17  ;;  %v1506_v30 = vld [vmem:[%s2395_s9] ss:$0 sm:$0xff] }
   0xa   :  { %1801 = vmatpush3.bf16.msra.mxu1 %v1800_v9  ;;  %1810 = vmatpush3.bf16.msra.mxu0 %v2042_v21  ;;  %v225_v36 = vld [vmem:[%s2392_s1 + $0x20] sm:$0xff] }
   0xb   :  { %1802 = vmatprep.subr.bf16.mxu1 %v1907_v5  ;;  %1811 = vmatprep.subr.bf16.mxu0 %v1907_v5  ;;  %v1047_v15 = vld [vmem:[%s2396_s10] sm:$0xff] }
   0xc   :  { %1659 = vmatprep.mubr.msk.f32.mxu0 %vm56_vm1, %v223_v24  ;;  %v1850_v17 = vpack.c.bf16 %v1048_v16, %v1047_v15 }
   0xd   :  { %1660 = vmatmul.mubr.msk.f32.gmra.mrb[2].mxu0 %vm56_vm1, %v224_v35  ;;  %v1352_v35 = vld [vmem:[%s2398_s2 + $0x8] sm:$0xff] }
   0xe   :  { %1813 = vmatpush3.bf16.msra.mxu0 %v2048_v23  ;;  %1662 = vmatprep.mubr.msk.f32.mxu0 %vm56_vm1, %v225_v36  ;;  %v1354_v36 = vld [vmem:[%s2398_s2 + $0x18] sm:$0xff] }
   0xf   :  { %1820 = vmatprep.subr.bf16.mxu0 %v1907_v5 }
  0x11   :  { %1663 = vmatmul.mubr.msk.f32.gmra.mrb[4].mxu0 %vm56_vm1, %v226_v37  ;;  %v1356_v37 = vld [vmem:[%s2398_s2 + $0x28] sm:$0xff] }
  0x12   :  { %1665 = vmatprep.mubr.msk.f32.mxu0 %vm56_vm1, %v227_v38  ;;  %v1355_v38 = vld [vmem:[%s2398_s2 + $0x20] sm:$0xff] }
  0x15   :  { %1666 = vmatmul.mubr.msk.f32.gmra.mrb[6].mxu0 %vm56_vm1, %v228_v39 }
  0x16   :  { %1687 = vmatprep.mubr.msk.f32.mxu0 %vm1906_vm2, %v1905_v0 }
  0xd6   :  { %v130_v11 = vpop.f32.mrb[0].mxu1 }
  0xd7   :  { %v131_v12 = vadd.f32 %v1501_v10, %v130_v11  ;;  %v1642_v13 = vpop.f32.mrb[1].mxu1 }
  0xd9   :  { %v134_v14 = vmax.f32 %v131_v12, 0.0 }
  0xdb   :  { %1652 = vmatmul.mubr.msk.f32.vlgmr.msra.gmra.mrb[2].mxu1 %vm146_vm3, %v134_v14 }
  0xdc   :  { %1676 = vmatprep.mubr.msk.f32.mxu1 %vm1906_vm2, %v1905_v0  ;;  %1804 = vmatpush3.bf16.msra.mxu1 %v2042_v21  ;;  %v1658_v31 = vpop.f32.mrb[0].mxu0 }
  0xdd   :  { %1805 = vmatprep.subr.bf16.mxu1 %v1907_v5  ;;  %v336_v32 = vadd.f32 %v1658_v31, %v1506_v30  ;;  %v330_v33 = vpop.f32.mrb[1].mxu0  ;;  %v1196_v31 = vld [vmem:[%s2397_s12 + $0x8] sm:$0xff] }
  0xde   :  { %v331_v34 = vadd.f32 %v1506_v30, %v330_v33  ;;  %v1351_v33 = vld [vmem:[%s2398_s2] sm:$0xff] }
  0xdf   :  { %370 = vst.msk [vmem:[#allocation2 + $0x8] sm:$0xff] %vm146_vm3, %v336_v32  ;;  %1367 = vrot.lane.b32.xlu0 %v1351_v33, %s1908_s22 }
  0xe0   :  { %1807 = vmatpush3.bf16.msra.mxu1 %v2048_v23  ;;  %369 = vst.msk [vmem:[#allocation2] sm:$0xff] %vm146_vm3, %v331_v34  ;;  %v1661_v45 = vpop.f32.mrb[2].mxu0  ;;  %v1353_v34 = vld [vmem:[%s2398_s2 + $0x10] sm:$0xff] }
  0xe1   :  { %1814 = vmatprep.subr.bf16.mxu1 %v1907_v5  ;;  %v346_v46 = vadd.f32 %v1661_v45, %v1506_v30  ;;  %v340_v47 = vpop.f32.mrb[3].mxu0  ;;  %1371 = vrot.lane.b32.xlu1 %v1353_v34, %s1908_s22 }
  0xe2   :  { %v341_v48 = vadd.f32 %v1506_v30, %v340_v47  ;;  %v1198_v47 = vld [vmem:[%s2397_s12 + $0x18] sm:$0xff] }
  0xe3   :  { %372 = vst.msk [vmem:[#allocation2 + $0x18] sm:$0xff] %vm146_vm3, %v346_v46  ;;  %1369 = vrot.lane.b32.xlu0 %v1352_v35, %s1908_s22  ;;  %v1197_v46 = vld [vmem:[%s2397_s12 + $0x10] sm:$0xff] }
  0xe4   :  { %371 = vst.msk [vmem:[#allocation2 + $0x10] sm:$0xff] %vm146_vm3, %v341_v48  ;;  %v1664_v49 = vpop.f32.mrb[4].mxu0 }
  0xe5   :  { %v356_v50 = vadd.f32 %v1664_v49, %v1506_v30  ;;  %v350_v51 = vpop.f32.mrb[5].mxu0  ;;  %1373 = vrot.lane.b32.xlu1 %v1354_v36, %s1908_s22 }
  0xe6   :  { %v351_v52 = vadd.f32 %v1506_v30, %v350_v51  ;;  %v459_v57 = vld [vmem:[#allocation2 + $0x8] sm:$0xff] }
  0xe7   :  { %v377_v40 = vld [vmem:[#allocation2] sm:$0xff]  ;;  %374 = vst.msk [vmem:[#allocation2 + $0x28] sm:$0xff] %vm146_vm3, %v356_v50  ;;  %1375 = vrot.lane.b32.xlu0 %v1355_v38, %s1908_s22  ;;  %v1862_v50 = vpack.c.bf16 %v1198_v47, %v1197_v46 }
  0xe8   :  { %373 = vst.msk [vmem:[#allocation2 + $0x20] sm:$0xff] %vm146_vm3, %v351_v52  ;;  %v1667_v53 = vpop.f32.mrb[6].mxu0 }
  0xe9   :  { %v366_v54 = vadd.f32 %v1667_v53, %v1506_v30  ;;  %v360_v55 = vpop.f32.mrb[7].mxu0  ;;  %1377 = vrot.lane.b32.xlu1 %v1356_v37, %s1908_s22 }
  0xea   :  { %v361_v56 = vadd.f32 %v1506_v30, %v360_v55  ;;  %v625_v4 = vld [vmem:[#allocation2 + $0x18] sm:$0xff]  ;;  %v1195_v30 = vld [vmem:[%s2397_s12] sm:$0xff] }
  0xeb   :  { %376 = vst.msk [vmem:[#allocation2 + $0x38] sm:$0xff] %vm146_vm3, %v366_v54  ;;  %v542_v62 = vld [vmem:[#allocation2 + $0x10] sm:$0xff]  ;;  %v1858_v32 = vpack.c.bf16 %v1196_v31, %v1195_v30 }
  0xec   :  { %375 = vst.msk [vmem:[#allocation2 + $0x30] sm:$0xff] %vm146_vm3, %v361_v56 }
  0xee   :  { %v791_v18 = vld [vmem:[#allocation2 + $0x28] sm:$0xff] }
  0xef   :  { %v708_v10 = vld [vmem:[#allocation2 + $0x20] sm:$0xff] }
  0xf3   :  { %v874_v39 = vld [vmem:[#allocation2 + $0x30] sm:$0xff] }
 0x153   :  { %v1372_v33 = vpop.permute.xlu1 %1371 }
 0x157   :  { %v1374_v38 = vpop.permute.xlu1 %1373 }
 0x1ae   :  { %v216_v26 = vpop.f32.mrb[2].mxu1 }
 0x1af   :  { %v217_v27 = vadd.f32 %v1504_v25, %v216_v26  ;;  %v1653_v28 = vpop.f32.mrb[3].mxu1 }
 0x1b1   :  { %1871 = vtanh.f32 %v217_v27 }
 0x1bb   :  { %v1872_v29 = vpop.eup %1871 }
 0x1bc   :  { %1677 = vmatmul.mubr.msk.f32.vlgmr.msra.gmra.mrb[4].mxu1 %vm146_vm3, %v1872_v29 }
 0x1bd   :  { %1816 = vmatpush3.bf16.msra.mxu1 %v2042_v21  ;;  %1698 = vmatprep.mubr.msk.f32.mxu1 %vm1906_vm2, %v1905_v0 }
 0x1be   :  { %1817 = vmatprep.subr.bf16.mxu1 %v1907_v5 }
 0x1c1   :  { %1819 = vmatpush3.bf16.msra.mxu1 %v2048_v23 }
 0x1c2   :  { %1826 = vmatprep.subr.bf16.mxu1 %v1907_v5 }
 0x28f   :  { %v451_v41 = vpop.f32.mrb[4].mxu1 }
 0x290   :  { %v455_v42 = vadd.f32 %v451_v41, %v377_v40  ;;  %v1678_v43 = vpop.f32.mrb[5].mxu1 }
 0x291   :  { %v2195_v43 = vld [vmem:[%s2399_s11] ss:$0 sm:$0xff] }
 0x292   :  { %1873 = vtanh.f32 %v455_v42 }
 0x29c   :  { %v1874_v44 = vpop.eup %1873 }
 0x29d   :  { %457 = vst.msk [vmem:[#allocation3] sm:$0xff] %vm146_vm3, %v1874_v44  ;;  %1688 = vmatmul.mubr.msk.f32.vlgmr.msra.gmra.mrb[8].mxu0 %vm146_vm3, %v1874_v44 }
 0x29e   :  { %1822 = vmatpush3.bf16.msra.mxu0 %v2042_v21  ;;  %1709 = vmatprep.mubr.msk.f32.mxu0 %vm1906_vm2, %v1905_v0 }
 0x29f   :  { %1823 = vmatprep.subr.bf16.mxu0 %v1907_v5 }
 0x2a2   :  { %1825 = vmatpush3.bf16.msra.mxu0 %v2048_v23 }
 0x2a3   :  { %1832 = vmatprep.subr.bf16.mxu0 %v1907_v5 }
 0x2a4   :  { %v1039_v24 = vld [vmem:[#allocation3] sm:$0xff] }
 0x370   :  { %v533_v58 = vpop.f32.mrb[8].mxu0 }
 0x371   :  { %v537_v59 = vadd.f32 %v533_v58, %v459_v57  ;;  %v1689_v60 = vpop.f32.mrb[9].mxu0 }
 0x373   :  { %1875 = vtanh.f32 %v537_v59 }
 0x37d   :  { %v1876_v61 = vpop.eup %1875 }
 0x37e   :  { %540 = vst.msk [vmem:[#allocation3 + $0x8] sm:$0xff] %vm146_vm3, %v1876_v61  ;;  %1699 = vmatmul.mubr.msk.f32.vlgmr.msra.gmra.mrb[6].mxu1 %vm146_vm3, %v1876_v61 }
 0x37f   :  { %1828 = vmatpush3.bf16.msra.mxu1 %v2042_v21  ;;  %1720 = vmatprep.mubr.msk.f32.mxu1 %vm1906_vm2, %v1905_v0 }
 0x380   :  { %1829 = vmatprep.subr.bf16.mxu1 %v1907_v5 }
 0x383   :  { %1831 = vmatpush3.bf16.msra.mxu1 %v2048_v23 }
 0x384   :  { %1838 = vmatprep.subr.bf16.mxu1 %v1907_v5 }
 0x385   :  { %v1040_v25 = vld [vmem:[#allocation3 + $0x8] sm:$0xff] }
 0x451   :  { %v616_v63 = vpop.f32.mrb[6].mxu1 }
 0x452   :  { %v620_v1 = vadd.f32 %v616_v63, %v542_v62  ;;  %v1700_v2 = vpop.f32.mrb[7].mxu1 }
 0x454   :  { %1877 = vtanh.f32 %v620_v1 }
 0x45e   :  { %v1878_v3 = vpop.eup %1877 }
 0x45f   :  { %623 = vst.msk [vmem:[#allocation3 + $0x10] sm:$0xff] %vm146_vm3, %v1878_v3  ;;  %1710 = vmatmul.mubr.msk.f32.vlgmr.msra.gmra.mrb[10].mxu0 %vm146_vm3, %v1878_v3 }
 0x460   :  { %1834 = vmatpush3.bf16.msra.mxu0 %v2042_v21  ;;  %1731 = vmatprep.mubr.msk.f32.mxu0 %vm1906_vm2, %v1905_v0 }
 0x461   :  { %1835 = vmatprep.subr.bf16.mxu0 %v1907_v5 }
 0x464   :  { %1837 = vmatpush3.bf16.msra.mxu0 %v2048_v23 }
 0x465   :  { %1844 = vmatprep.subr.bf16.mxu0 %v1907_v5 }
 0x466   :  { %v1041_v26 = vld [vmem:[#allocation3 + $0x10] sm:$0xff] }
 0x532   :  { %v699_v6 = vpop.f32.mrb[10].mxu0 }
 0x533   :  { %v703_v7 = vadd.f32 %v699_v6, %v625_v4  ;;  %v1711_v8 = vpop.f32.mrb[11].mxu0  ;;  %v1358_v4 = vld [vmem:[%s2398_s2 + $0x38] sm:$0xff]  ;;  %v1357_v6 = vld [vmem:[%s2398_s2 + $0x30] sm:$0xff] }
 0x534   :  { %1381 = vrot.lane.b32.xlu1 %v1358_v4, %s1908_s22  ;;  %1379 = vrot.lane.b32.xlu0 %v1357_v6, %s1908_s22 }
 0x535   :  { %1879 = vtanh.f32 %v703_v7  ;;  %v957_v7 = vld [vmem:[#allocation2 + $0x38] sm:$0xff] }
 0x53f   :  { %v1880_v9 = vpop.eup %1879 }
 0x540   :  { %706 = vst.msk [vmem:[#allocation3 + $0x18] sm:$0xff] %vm146_vm3, %v1880_v9  ;;  %1721 = vmatmul.mubr.msk.f32.vlgmr.msra.gmra.mrb[8].mxu1 %vm146_vm3, %v1880_v9 }
 0x541   :  { %1840 = vmatpush3.bf16.msra.mxu1 %v2042_v21  ;;  %1742 = vmatprep.mubr.msk.f32.mxu1 %vm1906_vm2, %v1905_v0 }
 0x542   :  { %1841 = vmatprep.subr.bf16.mxu1 %v1907_v5 }
 0x545   :  { %1843 = vmatpush3.bf16.msra.mxu1 %v2048_v23 }
 0x546   :  { %1851 = vmatprep.subr.bf16.mxu1 %v1850_v17 }
 0x547   :  { %v1042_v27 = vld [vmem:[#allocation3 + $0x18] sm:$0xff] }
 0x613   :  { %v782_v11 = vpop.f32.mrb[8].mxu1 }
 0x614   :  { %v786_v12 = vadd.f32 %v782_v11, %v708_v10  ;;  %v1722_v13 = vpop.f32.mrb[9].mxu1  ;;  %v2229_v11 = vld [vmem:[%s2400_s13] ss:$0 sm:$0xff] }
 0x616   :  { %1881 = vtanh.f32 %v786_v12 }
 0x620   :  { %v1882_v14 = vpop.eup %1881 }
 0x621   :  { %789 = vst.msk [vmem:[#allocation3 + $0x20] sm:$0xff] %vm146_vm3, %v1882_v14  ;;  %1732 = vmatmul.mubr.msk.f32.vlgmr.msra.gmra.mrb[12].mxu0 %vm146_vm3, %v1882_v14 }
 0x622   :  { %1846 = vmatpush3.bf16.msra.mxu0 %v2042_v21  ;;  %1753 = vmatprep.mubr.msk.f32.mxu0 %vm1906_vm2, %v1905_v0  ;;  %v1049_v0 = vld [vmem:[%s2396_s10 + $0x10] sm:$0xff] }
 0x623   :  { %1847 = vmatprep.subr.bf16.mxu0 %v1907_v5  ;;  %v1050_v5 = vld [vmem:[%s2396_s10 + $0x18] sm:$0xff] }
 0x624   :  { %v1854_v22 = vpack.c.bf16 %v1050_v5, %v1049_v0 }
 0x626   :  { %1849 = vmatpush3.bf16.msra.mxu0 %v2048_v23 }
 0x627   :  { %1859 = vmatprep.subr.bf16.mxu0 %v1858_v32 }
 0x628   :  { %v1043_v28 = vld [vmem:[#allocation3 + $0x20] sm:$0xff] }
 0x6f4   :  { %v865_v19 = vpop.f32.mrb[12].mxu0 }
 0x6f5   :  { %v869_v20 = vadd.f32 %v865_v19, %v791_v18  ;;  %v1733_v21 = vpop.f32.mrb[13].mxu0 }
 0x6f7   :  { %1883 = vtanh.f32 %v869_v20 }
 0x701   :  { %v1884_v23 = vpop.eup %1883 }
 0x702   :  { %872 = vst.msk [vmem:[#allocation3 + $0x28] sm:$0xff] %vm146_vm3, %v1884_v23  ;;  %1743 = vmatmul.mubr.msk.f32.vlgmr.msra.gmra.mrb[10].mxu1 %vm146_vm3, %v1884_v23 }
 0x703   :  { %1853 = vmatpush3.bf16.msra.mxu1 %v1850_v17  ;;  %1764 = vmatprep.mubr.msk.f32.mxu1 %vm146_vm3, %v1039_v24 }
 0x704   :  { %1855 = vmatprep.subr.bf16.mxu1 %v1854_v22 }
 0x707   :  { %1857 = vmatpush3.bf16.msra.mxu1 %v1854_v22 }
 0x709   :  { %v1044_v29 = vld [vmem:[#allocation3 + $0x28] sm:$0xff] }
 0x70a   :  { %1765 = vmatmul.mubr.msk.f32.vlgmr.msra.gmra.mrb[12].mxu1 %vm146_vm3, %v1040_v25  ;;  %v1368_v25 = vpop.permute.xlu0 %1367 }
 0x70b   :  { %1767 = vmatprep.mubr.msk.f32.mxu1 %vm146_vm3, %v1041_v26 }
 0x70e   :  { %1768 = vmatmul.mubr.msk.f32.gmra.mrb[14].mxu1 %vm146_vm3, %v1042_v27  ;;  %v1370_v30 = vpop.permute.xlu0 %1369 }
 0x70f   :  { %1770 = vmatprep.mubr.msk.f32.mxu1 %vm146_vm3, %v1043_v28 }
 0x712   :  { %1771 = vmatmul.mubr.msk.f32.gmra.mrb[16].mxu1 %vm146_vm3, %v1044_v29  ;;  %v1376_v46 = vpop.permute.xlu0 %1375 }
 0x7d5   :  { %v948_v40 = vpop.f32.mrb[10].mxu1 }
 0x7d6   :  { %v952_v41 = vadd.f32 %v948_v40, %v874_v39  ;;  %v1744_v42 = vpop.f32.mrb[11].mxu1 }
 0x7d8   :  { %1885 = vtanh.f32 %v952_v41 }
 0x7dd   :  { %v1766_v44 = vpop.f32.mrb[12].mxu1 }
 0x7de   :  { %v1148_v45 = vpop.f32.mrb[13].mxu1  ;;  %v1154_v54 = vadd.f32 %v1766_v44, %v2195_v43  ;;  %v1378_v44 = vpop.permute.xlu1 %1377 }
 0x7df   :  { %v1149_v48 = vadd.f32 %v2195_v43, %v1148_v45 }
 0x7e0   :  { %v1188_v58 = vmax.f32 %v1154_v54, 0.0 }
 0x7e1   :  { %v1769_v49 = vpop.f32.mrb[14].mxu1  ;;  %v1187_v52 = vmax.f32 %v1149_v48, 0.0 }
 0x7e2   :  { %v1886_v51 = vpop.eup %1885  ;;  %v1158_v53 = vpop.f32.mrb[15].mxu1  ;;  %v1164_v59 = vadd.f32 %v1769_v49, %v2195_v43 }
 0x7e3   :  { %955 = vst.msk [vmem:[#allocation3 + $0x30] sm:$0xff] %vm146_vm3, %v1886_v51  ;;  %1754 = vmatmul.mubr.msk.f32.vlgmr.msra.gmra.mrb[14].mxu0 %vm146_vm3, %v1886_v51  ;;  %v1159_v56 = vadd.f32 %v2195_v43, %v1158_v53  ;;  %v1382_v49 = vpop.permute.xlu1 %1381 }
 0x7e4   :  { %1861 = vmatpush3.bf16.msra.mxu0 %v1858_v32  ;;  %1784 = vmatprep.mubr.msk.f32.mxu0 %vm146_vm3, %v1187_v52  ;;  %v1190_v63 = vmax.f32 %v1164_v59, 0.0 }
 0x7e5   :  { %v1772_v55 = vpop.f32.mrb[16].mxu1  ;;  %1863 = vmatprep.subr.bf16.mxu0 %v1862_v50  ;;  %v1189_v60 = vmax.f32 %v1159_v56, 0.0 }
 0x7e6   :  { %v1168_v57 = vpop.f32.mrb[17].mxu1  ;;  %v1174_v1 = vadd.f32 %v1772_v55, %v2195_v43 }
 0x7e7   :  { %v1169_v61 = vadd.f32 %v2195_v43, %v1168_v57 }
 0x7e8   :  { %1865 = vmatpush3.bf16.msra.mxu0 %v1862_v50  ;;  %v1192_v3 = vmax.f32 %v1174_v1, 0.0  ;;  %v1380_v50 = vpop.permute.xlu0 %1379 }
 0x7e9   :  { %v1191_v2 = vmax.f32 %v1169_v61, 0.0 }
 0x7ea   :  { %v1045_v62 = vld [vmem:[#allocation3 + $0x30] sm:$0xff] }
 0x7eb   :  { %1785 = vmatmul.mubr.msk.f32.vlgmr.msra.gmra.mrb[16].mxu0 %vm146_vm3, %v1188_v58  ;;  %1773 = vmatprep.mubr.msk.f32.mxu1 %vm146_vm3, %v1045_v62 }
 0x7ec   :  { %1787 = vmatprep.mubr.msk.f32.mxu0 %vm146_vm3, %v1189_v60 }
 0x7ef   :  { %1788 = vmatmul.mubr.msk.f32.gmra.mrb[18].mxu0 %vm146_vm3, %v1190_v63 }
 0x7f0   :  { %1790 = vmatprep.mubr.msk.f32.mxu0 %vm146_vm3, %v1191_v2 }
 0x7f3   :  { %1791 = vmatmul.mubr.msk.f32.gmra.mrb[20].mxu0 %vm146_vm3, %v1192_v3 }
 0x8b6   :  { %v1031_v8 = vpop.f32.mrb[14].mxu0 }
 0x8b7   :  { %v1035_v9 = vadd.f32 %v1031_v8, %v957_v7  ;;  %v1755_v10 = vpop.f32.mrb[15].mxu0 }
 0x8b9   :  { %1887 = vtanh.f32 %v1035_v9 }
 0x8be   :  { %v1786_v12 = vpop.f32.mrb[16].mxu0 }
 0x8bf   :  { %v2232_v13 = vadd.f32 %v1786_v12, %v2229_v11  ;;  %v1296_v14 = vpop.f32.mrb[17].mxu0 }
 0x8c0   :  { %v2235_v15 = vadd.f32 %v2229_v11, %v1296_v14 }
 0x8c1   :  { %v1337_v16 = vmul.f32 1.442695, %v2232_v13  ;;  %1543 = vst.msk [vmem:[%s2401_s14 + $0x48] sm:$0xff] %vm56_vm1, %v2232_v13 }
 0x8c2   :  { %v1335_v17 = vmul.f32 1.442695, %v2235_v15  ;;  %1542 = vst.msk [vmem:[%s2401_s14 + $0x40] sm:$0xff] %vm56_vm1, %v2235_v15  ;;  %v1789_v18 = vpop.f32.mrb[18].mxu0 }
 0x8c3   :  { %v1888_v19 = vpop.eup %1887  ;;  %1889 = vpow2.f32 %v1337_v16  ;;  %v2250_v20 = vadd.f32 %v1789_v18, %v2229_v11  ;;  %v1306_v21 = vpop.f32.mrb[19].mxu0 }
 0x8c4   :  { %1038 = vst.msk [vmem:[#allocation3 + $0x38] sm:$0xff] %vm146_vm3, %v1888_v19  ;;  %1891 = vpow2.f32 %v1335_v17  ;;  %v2254_v0 = vadd.f32 %v2229_v11, %v1306_v21 }
 0x8c5   :  { %1545 = vst.msk [vmem:[%s2401_s14 + $0x58] sm:$0xff] %vm56_vm1, %v2250_v20  ;;  %v1341_v22 = vmul.f32 1.442695, %v2250_v20 }
 0x8c6   :  { %1544 = vst.msk [vmem:[%s2401_s14 + $0x50] sm:$0xff] %vm56_vm1, %v2254_v0  ;;  %v1792_v5 = vpop.f32.mrb[20].mxu0  ;;  %v1339_v26 = vmul.f32 1.442695, %v2254_v0 }
 0x8c7   :  { %v2268_v23 = vadd.f32 %v1792_v5, %v2229_v11  ;;  %v1316_v24 = vpop.f32.mrb[21].mxu0  ;;  %1893 = vpow2.f32 %v1341_v22 }
 0x8c8   :  { %v2272_v27 = vadd.f32 %v2229_v11, %v1316_v24  ;;  %1895 = vpow2.f32 %v1339_v26 }
 0x8c9   :  { %1547 = vst.msk [vmem:[%s2401_s14 + $0x68] sm:$0xff] %vm56_vm1, %v2268_v23  ;;  %v1345_v32 = vmul.f32 1.442695, %v2268_v23 }
 0x8ca   :  { %1546 = vst.msk [vmem:[%s2401_s14 + $0x60] sm:$0xff] %vm56_vm1, %v2272_v27  ;;  %v1343_v34 = vmul.f32 1.442695, %v2272_v27 }
 0x8cb   :  { %v1046_v28 = vld [vmem:[#allocation3 + $0x38] sm:$0xff]  ;;  %1897 = vpow2.f32 %v1345_v32 }
 0x8cc   :  { %1774 = vmatmul.mubr.msk.f32.gmra.mrb[18].mxu1 %vm146_vm3, %v1046_v28  ;;  %1899 = vpow2.f32 %v1343_v34 }
 0x8cd   :  { %v1890_v29 = vpop.eup %1889 }
 0x8ce   :  { %v1892_v31 = vpop.eup %1891  ;;  %1466 = vrot.lane.b32.xlu1 %v1890_v29, %s1909_s25  ;;  %v1392_v35 = vmul.f32 %v1890_v29, %v1370_v30 }
 0x8cf   :  { %1464 = vrot.lane.b32.xlu0 %v1892_v31, %s1909_s25  ;;  %v1391_v36 = vmul.f32 %v1892_v31, %v1368_v25 }
 0x8d1   :  { %v1894_v37 = vpop.eup %1893 }
 0x8d2   :  { %1409 = vrot.lane.b32.xlu1 %v1392_v35, %s1909_s25  ;;  %v1896_v39 = vpop.eup %1895  ;;  %v1394_v40 = vmul.f32 %v1894_v37, %v1374_v38 }
 0x8d3   :  { %1407 = vrot.lane.b32.xlu0 %v1391_v36, %s1909_s25  ;;  %v1393_v41 = vmul.f32 %v1896_v39, %v1372_v33 }
 0x8d5   :  { %v1898_v42 = vpop.eup %1897 }
 0x8d6   :  { %1470 = vrot.lane.b32.xlu1 %v1894_v37, %s1909_s25  ;;  %v1900_v45 = vpop.eup %1899  ;;  %v1396_v47 = vmul.f32 %v1898_v42, %v1378_v44 }
 0x8d7   :  { %1468 = vrot.lane.b32.xlu0 %v1896_v39, %s1909_s25  ;;  %v1395_v48 = vmul.f32 %v1900_v45, %v1376_v46 }
 0x8da   :  { %1413 = vrot.lane.b32.xlu1 %v1394_v40, %s1909_s25 }
 0x8db   :  { %1411 = vrot.lane.b32.xlu0 %v1393_v41, %s1909_s25 }
 0x8de   :  { %1474 = vrot.lane.b32.xlu1 %v1898_v42, %s1909_s25 }
 0x8df   :  { %1472 = vrot.lane.b32.xlu0 %v1900_v45, %s1909_s25 }
 0x8e2   :  { %1417 = vrot.lane.b32.xlu1 %v1396_v47, %s1909_s25 }
 0x8e3   :  { %1415 = vrot.lane.b32.xlu0 %v1395_v48, %s1909_s25 }
 0x940   :  { %v1467_v51 = vpop.permute.xlu1 %1466 }
 0x941   :  { %1551 = vst.msk [vmem:[%s2401_s14 + $0x88] sm:$0xff] %vm56_vm1, %v1467_v51  ;;  %v1465_v52 = vpop.permute.xlu0 %1464 }
 0x942   :  { %1550 = vst.msk [vmem:[%s2401_s14 + $0x80] sm:$0xff] %vm56_vm1, %v1465_v52 }
 0x944   :  { %v1410_v53 = vpop.permute.xlu1 %1409 }
 0x945   :  { %v1432_v54 = vadd.f32 %v1410_v53, %v2232_v13  ;;  %v1408_v55 = vpop.permute.xlu0 %1407 }
 0x946   :  { %v1431_v56 = vadd.f32 %v1408_v55, %v2235_v15 }
 0x947   :  { %1440 = vst.msk [vmem:[%s2401_s14 + $0x8] sm:$0xff] %vm56_vm1, %v1432_v54 }
 0x948   :  { %1439 = vst.msk [vmem:[%s2401_s14] sm:$0xff] %vm56_vm1, %v1431_v56  ;;  %v1471_v57 = vpop.permute.xlu1 %1470 }
 0x949   :  { %1553 = vst.msk [vmem:[%s2401_s14 + $0x98] sm:$0xff] %vm56_vm1, %v1471_v57  ;;  %v1469_v58 = vpop.permute.xlu0 %1468 }
 0x94a   :  { %1552 = vst.msk [vmem:[%s2401_s14 + $0x90] sm:$0xff] %vm56_vm1, %v1469_v58 }
 0x94c   :  { %v1414_v59 = vpop.permute.xlu1 %1413 }
 0x94d   :  { %v1434_v60 = vadd.f32 %v1414_v59, %v2250_v20  ;;  %v1412_v61 = vpop.permute.xlu0 %1411 }
 0x94e   :  { %v1433_v62 = vadd.f32 %v1412_v61, %v2254_v0 }
 0x94f   :  { %1442 = vst.msk [vmem:[%s2401_s14 + $0x18] sm:$0xff] %vm56_vm1, %v1434_v60 }
 0x950   :  { %1441 = vst.msk [vmem:[%s2401_s14 + $0x10] sm:$0xff] %vm56_vm1, %v1433_v62  ;;  %v1475_v63 = vpop.permute.xlu1 %1474 }
 0x951   :  { %1555 = vst.msk [vmem:[%s2401_s14 + $0xa8] sm:$0xff] %vm56_vm1, %v1475_v63  ;;  %v1473_v1 = vpop.permute.xlu0 %1472 }
 0x952   :  { %1554 = vst.msk [vmem:[%s2401_s14 + $0xa0] sm:$0xff] %vm56_vm1, %v1473_v1 }
 0x954   :  { %v1418_v2 = vpop.permute.xlu1 %1417 }
 0x955   :  { %v1436_v3 = vadd.f32 %v1418_v2, %v2268_v23  ;;  %v1416_v4 = vpop.permute.xlu0 %1415 }
 0x956   :  { %v1435_v6 = vadd.f32 %v1416_v4, %v2272_v27 }
 0x957   :  { %1444 = vst.msk [vmem:[%s2401_s14 + $0x28] sm:$0xff] %vm56_vm1, %v1436_v3 }
 0x958   :  { %1443 = vst.msk [vmem:[%s2401_s14 + $0x20] sm:$0xff] %vm56_vm1, %v1435_v6 }
 0x99f   :  { %v1775_v7 = vpop.f32.mrb[18].mxu1 }
 0x9a0   :  { %v1184_v8 = vadd.f32 %v1775_v7, %v2195_v43  ;;  %v1178_v9 = vpop.f32.mrb[19].mxu1 }
 0x9a1   :  { %v1179_v10 = vadd.f32 %v2195_v43, %v1178_v9 }
 0x9a2   :  { %v1194_v13 = vmax.f32 %v1184_v8, 0.0 }
 0x9a3   :  { %v1193_v12 = vmax.f32 %v1179_v10, 0.0 }
 0x9a5   :  { %1793 = vmatprep.mubr.msk.f32.mxu0 %vm146_vm3, %v1193_v12 }
 0x9a6   :  { %1794 = vmatmul.mubr.msk.f32.gmra.mrb[22].mxu0 %vm146_vm3, %v1194_v13 }
 0xa79   :  { %v1795_v14 = vpop.f32.mrb[22].mxu0 }
 0xa7a   :  { %v1332_v15 = vadd.f32 %v1795_v14, %v2229_v11  ;;  %v1326_v16 = vpop.f32.mrb[23].mxu0 }
 0xa7b   :  { %v1327_v17 = vadd.f32 %v2229_v11, %v1326_v16 }
 0xa7c   :  { %v1349_v18 = vmul.f32 1.442695, %v1332_v15  ;;  %1549 = vst.msk [vmem:[%s2401_s14 + $0x78] sm:$0xff] %vm56_vm1, %v1332_v15 }
 0xa7d   :  { %v1347_v19 = vmul.f32 1.442695, %v1327_v17  ;;  %1548 = vst.msk [vmem:[%s2401_s14 + $0x70] sm:$0xff] %vm56_vm1, %v1327_v17 }
 0xa7e   :  { %1901 = vpow2.f32 %v1349_v18 }
 0xa7f   :  { %1903 = vpow2.f32 %v1347_v19 }
 0xa88   :  { %v1902_v43 = vpop.eup %1901 }
 0xa89   :  { %v1904_v20 = vpop.eup %1903  ;;  %v1398_v21 = vmul.f32 %v1902_v43, %v1382_v49 }
 0xa8a   :  { %v1397_v0 = vmul.f32 %v1904_v20, %v1380_v50 }
 0xa8b   :  { %1421 = vrot.lane.b32.xlu1 %v1398_v21, %s1909_s25 }
 0xa8c   :  { %1419 = vrot.lane.b32.xlu0 %v1397_v0, %s1909_s25 }
 0xa8f   :  { %1478 = vrot.lane.b32.xlu1 %v1902_v43, %s1909_s25 }
 0xa90   :  { %1476 = vrot.lane.b32.xlu0 %v1904_v20, %s1909_s25 }
 0xafd   :  { %v1422_v11 = vpop.permute.xlu1 %1421 }
 0xafe   :  { %v1438_v5 = vadd.f32 %v1422_v11, %v1332_v15  ;;  %v1420_v22 = vpop.permute.xlu0 %1419 }
 0xaff   :  { %v1437_v23 = vadd.f32 %v1420_v22, %v1327_v17 }
 0xb00   :  { %1446 = vst.msk [vmem:[%s2401_s14 + $0x38] sm:$0xff] %vm56_vm1, %v1438_v5 }
 0xb01   :  { %1445 = vst.msk [vmem:[%s2401_s14 + $0x30] sm:$0xff] %vm56_vm1, %v1437_v23  ;;  %v1479_v24 = vpop.permute.xlu1 %1478 }
 0xb02   :  { %1557 = vst.msk [vmem:[%s2401_s14 + $0xb8] sm:$0xff] %vm56_vm1, %v1479_v24  ;;  %v1477_v25 = vpop.permute.xlu0 %1476 }
 0xb03   :  { %1556 = vst.msk [vmem:[%s2401_s14 + $0xb0] sm:$0xff] %vm56_vm1, %v1477_v25 }

</bundles_post_ra>
